<compile_context>
chip_gen: v7x
topology: tpu7x:2x2x1
jax: 0.10.0
libtpu: 0.0.40
codegen_flags: <defaults>
</compile_context>

<pallas_src>
import jax
import jax.numpy as jnp
from jax.experimental import pallas as pl
from jax.experimental.pallas import tpu as pltpu

LEAKY_SLOPE = 0.01  # nn.LeakyReLU() default

_K2_VMEM_LIMIT = 40 * 1024 * 1024   # kernel 2: safe on every generation
_K2_BUDGET = 24 * 1024 * 1024       # kernel 2: block-byte budget (incl. 2x buffering)


def _round_up(x, m):
    return -(-x // m) * m


# ---------------------------------------------------------------------------
# Per-generation sizing
# ---------------------------------------------------------------------------
def _tpu_vmem_bytes():
    """Physical VMEM per TensorCore; used to size tiles per TPU generation."""
    try:
        return int(pltpu.get_tpu_info().vmem_capacity_bytes)
    except Exception:
        return 64 * 1024 * 1024  # conservative (v7x-sized) fallback


def _level1_defaults():
    """(pixel-tile cap, vmem_limit_bytes) for kernel 1.

    Working set per grid step ~= 40 sublanes * tw * 4 B (the 9-channel input
    block pads to 16 sublanes, the three 3-channel blocks use 8 each), times 2
    for double buffering:  tw=131072 -> ~42 MiB,  tw=65536 -> ~21 MiB."""
    vmem = _tpu_vmem_bytes()
    if vmem >= 100 * 1024 * 1024:           # v5e / v6e: 128 MiB physical VMEM
        return 131072, 80 * 1024 * 1024
    return 65536, 40 * 1024 * 1024          # v7x: 64 MiB physical VMEM


# ---------------------------------------------------------------------------
# Tile-size helpers
# ---------------------------------------------------------------------------
def _pick_pixel_tile(hw, cap):
    """Return (tile, padded_hw).

    Full row when small; else the largest 128-multiple divisor <= cap; else pad
    the pixel axis up to a multiple of the cap tile (pad, run, slice)."""
    if hw <= cap:
        return hw, hw
    t = (cap // 128) * 128
    while t >= 128:
        if hw % t == 0:
            return t, hw
        t -= 128
    t = (cap // 128) * 128
    return t, _round_up(hw, t)


def _valid_row_tiles(hk, h_c, sh):
    """Descending list of valid row tiles for kernel 2 (always contains hk)."""
    out = []
    for tr in range(hk, 0, -1):
        if hk % tr or tr % sh:
            continue
        trc = tr // sh
        if not (tr % 8 == 0 or tr == hk):
            continue
        if not (trc % 8 == 0 or trc == h_c):
            continue
        out.append(tr)
    return out


def _pick_col_tile(wk, sw, cap=1024):
    """Column tile for kernel 2: twk | wk and twk % (128*sw) == 0 so the coarse
    tile twk//sw stays lane-aligned; full width when the image is small."""
    if wk <= cap:
        return wk
    step = 128 * sw
    t = (cap // step) * step
    while t >= step:
        if wk % t == 0:
            return t
        t -= step
    # TODO(synk): pad the width for awkward sizes instead of full-width blocks.
    return wk


def _pick_row_tile(hk, h_c, sh, twk, twc, budget_bytes=_K2_BUDGET):
    """Largest valid row tile whose blocks (incl. double buffering and the
    rr/rc replication matrices) fit the VMEM budget."""
    twk_p = _round_up(twk, 128)
    twc_p = _round_up(twc, 128)

    def block_bytes(tr):
        trc = tr // sh
        fine = 3 * max(tr, 8) * twk_p * 4            # one (1,3,tr,twk) block
        coarse = 3 * max(trc, 8) * twc_p * 4         # the (1,3,trc,twc) block
        rr_b = max(tr, 8) * _round_up(trc, 128) * 4  # [tr, trc]
        rc_b = max(twc, 8) * twk_p * 4               # [twc, twk]
        # pyr + out + m1 are pipelined (x2 buffers); rr/rc counted x2 as well.
        return 2 * (2 * fine + coarse) + 2 * (rr_b + rc_b)

    tiles = _valid_row_tiles(hk, h_c, sh)
    for tr in tiles:
        if block_bytes(tr) <= budget_bytes:
            return tr
    # TODO(synk): smallest valid tile may still exceed the budget for extreme widths.
    return tiles[-1]


# ---------------------------------------------------------------------------
# Kernel 1: level-1 fused conv stack + multiply (channel-major [C, pixels])
# ---------------------------------------------------------------------------
def _level1_kernel(x_ref, pyr_ref, w1_ref, b1_ref, w2_ref, b2_ref,
                   tw1_ref, tb1_ref, tw2_ref, tb2_ref, res_ref, m1_ref):
    x = x_ref[0]  # [9, tw]

    h = jnp.dot(w1_ref[...], x, preferred_element_type=jnp.float32) + b1_ref[...]
    h = jnp.where(h > 0, h, LEAKY_SLOPE * h)
    mask = jnp.dot(w2_ref[...], h, preferred_element_type=jnp.float32) + b2_ref[...]

    # TODO(synk): cast to bf16 at the store if downstream consumers tolerate it
    # (halves HBM write traffic in this HBM-bound kernel).
    res_ref[0] = pyr_ref[0] * mask  # pyr_original[1] * mask

    g = jnp.dot(tw1_ref[...], mask, preferred_element_type=jnp.float32) + tb1_ref[...]
    g = jnp.where(g > 0, g, LEAKY_SLOPE * g)
    m1_ref[0] = jnp.dot(tw2_ref[...], g, preferred_element_type=jnp.float32) + tb2_ref[...]


def level1_conv_mul(x, pyr1, params, *, tw_cap=None, vmem_limit=None):
    n, cin, h, w = x.shape
    assert cin == 9
    hw = h * w

    cap_d, lim_d = _level1_defaults()
    tw_cap = tw_cap if tw_cap is not None else cap_d
    vmem_limit = vmem_limit if vmem_limit is not None else lim_d

    tw, hw_pad = _pick_pixel_tile(hw, tw_cap)
    assert hw_pad % tw == 0

    x3 = x.reshape(n, 9, hw)
    p3 = pyr1.reshape(n, 3, hw)
    if hw_pad != hw:
        pad = hw_pad - hw
        x3 = jnp.pad(x3, ((0, 0), (0, 0), (0, pad)))
        p3 = jnp.pad(p3, ((0, 0), (0, 0), (0, pad)))

    def pix_map(b, i):
        return (b, 0, i)

    def const_map(b, i):
        return (0, 0)

    res3, m13 = pl.pallas_call(
        _level1_kernel,
        out_shape=(jax.ShapeDtypeStruct((n, 3, hw_pad), jnp.float32),
                   jax.ShapeDtypeStruct((n, 3, hw_pad), jnp.float32)),
        grid=(n, hw_pad // tw),
        in_specs=[
            pl.BlockSpec((1, 9, tw), pix_map),
            pl.BlockSpec((1, 3, tw), pix_map),
            pl.BlockSpec((9, 9), const_map),
            pl.BlockSpec((9, 1), const_map),
            pl.BlockSpec((3, 9), const_map),
            pl.BlockSpec((3, 1), const_map),
            pl.BlockSpec((3, 3), const_map),
            pl.BlockSpec((3, 1), const_map),
            pl.BlockSpec((3, 3), const_map),
            pl.BlockSpec((3, 1), const_map),
        ],
        out_specs=(
            pl.BlockSpec((1, 3, tw), pix_map),
            pl.BlockSpec((1, 3, tw), pix_map),
        ),
        compiler_params=pltpu.CompilerParams(
            dimension_semantics=("parallel", "parallel"),
            vmem_limit_bytes=vmem_limit),
    )(x3, p3,
      params["m_w1"], params["m_b1"], params["m_w2"], params["m_b2"],
      params["t1_w1"], params["t1_b1"], params["t1_w2"], params["t1_b2"])

    if hw_pad != hw:
        res3 = res3[:, :, :hw]
        m13 = m13[:, :, :hw]
    return res3.reshape(n, 3, h, w), m13.reshape(n, 3, h, w)


# ---------------------------------------------------------------------------
# Kernel 2: fused nearest-upsample (integer scale) + elementwise multiply
#   cols = m1_block @ Rc   (lane replication, one MXU pass for all 3 channels)
#   up   = Rr @ cols       (sublane replication, tiny K)
#   res  = pyr * up
# ---------------------------------------------------------------------------
def _upsample_mul_kernel(pyr_ref, m1_ref, rr_ref, rc_ref, out_ref):
    rr = rr_ref[...]                      # [tr,  trc]
    rc = rc_ref[...]                      # [twc, twk]
    m1 = m1_ref[0]                        # [3, trc, twc]
    trc, twc = m1.shape[1], m1.shape[2]
    twk = rc.shape[1]

    # Lane replication: push rc to the MXU weight registers once, M = 3*trc.
    cols = jnp.dot(m1.reshape(3 * trc, twc), rc,
                   preferred_element_type=jnp.float32)        # [3*trc, twk]
    cols = cols.reshape(3, trc, twk)

    for ch in range(3):                   # cheap sublane replication (K = trc)
        up = jnp.dot(rr, cols[ch], preferred_element_type=jnp.float32)  # [tr, twk]
        out_ref[0, ch] = pyr_ref[0, ch] * up


def _nearest_resize_nchw(img, oh, ow):
    n, c, h, w = img.shape
    rows = (jnp.arange(oh) * h) // oh
    cols = (jnp.arange(ow) * w) // ow
    return img[:, :, rows][:, :, :, cols]


def upsample_mul(pyr_k, m1):
    n, c, hk, wk = pyr_k.shape
    _, _, h, w = m1.shape

    if hk % h != 0 or wk % w != 0:
        # TODO(synk): non-integer nearest scales fall back to XLA resize +
        # multiply (not exercised by Laplacian-pyramid shapes).
        return pyr_k * _nearest_resize_nchw(m1, hk, wk)

    sh, sw = hk // h, wk // w
    twk = _pick_col_tile(wk, sw)
    twc = twk // sw
    tr = _pick_row_tile(hk, h, sh, twk, twc)

    # v7x shards "parallel" grid axes across 2 TensorCores: ensure >= 2 steps
    # when batch == 1 so one core isn't idle for this level.
    if n * (hk // tr) * (wk // twk) < 2:
        smaller = [t for t in _valid_row_tiles(hk, h, sh) if t < tr]
        if smaller:
            tr = smaller[0]
    trc = tr // sh

    rr = (jnp.arange(tr)[:, None] // sh ==
          jnp.arange(trc)[None, :]).astype(jnp.float32)       # [tr,  trc]
    rc = (jnp.arange(twk)[None, :] // sw ==
          jnp.arange(twc)[:, None]).astype(jnp.float32)       # [twc, twk]

    def fine_map(b, i, j):
        return (b, 0, i, j)

    def const_map(b, i, j):
        return (0, 0)

    return pl.pallas_call(
        _upsample_mul_kernel,
        out_shape=jax.ShapeDtypeStruct((n, 3, hk, wk), jnp.float32),
        grid=(n, hk // tr, wk // twk),
        in_specs=[
            pl.BlockSpec((1, 3, tr, twk), fine_map),
            pl.BlockSpec((1, 3, trc, twc), fine_map),
            pl.BlockSpec((tr, trc), const_map),
            pl.BlockSpec((twc, twk), const_map),
        ],
        out_specs=pl.BlockSpec((1, 3, tr, twk), fine_map),
        compiler_params=pltpu.CompilerParams(
            dimension_semantics=("parallel", "parallel", "parallel"),
            vmem_limit_bytes=_K2_VMEM_LIMIT),
    )(pyr_k, m1, rr, rc)


# ---------------------------------------------------------------------------
# Trans_high forward (NCHW)
# ---------------------------------------------------------------------------
def trans_high_forward(params, x, pyr_original, fake_low):
    pyr1, pyr2, pyr3 = pyr_original[1], pyr_original[2], pyr_original[3]

    # mask = self.model(x); result_highfreq_1 = pyr_original[1] * mask
    # m1 = trans_mask_block_1(mask) at coarse resolution (commutes exactly with
    # nearest upsampling since every op is pointwise).
    res1, m1 = level1_conv_mul(x, pyr1, params)

    out = [fake_low, res1]
    # Levels 2 and 3 both reuse trans_mask_block_1 in the original forward.
    out.append(upsample_mul(pyr2, m1))
    out.append(upsample_mul(pyr3, m1))
    return out


# ---------------------------------------------------------------------------
# Deterministic parameter init (conv weights stored as [Cout, Cin], bias [Cout,1])
# ---------------------------------------------------------------------------
def init_params(key):
    ks = jax.random.split(key, 12)

    def w(k, co, ci):
        return jax.random.normal(k, (co, ci), jnp.float32) * 0.1

    def b(k, co):
        return jax.random.normal(k, (co, 1), jnp.float32) * 0.1

    return {
        # self.model: Conv2d(9,9,1) -> LeakyReLU -> Conv2d(9,3,1)
        "m_w1": w(ks[0], 9, 9), "m_b1": b(ks[1], 9),
        "m_w2": w(ks[2], 3, 9), "m_b2": b(ks[3], 3),
        # trans_mask_block_1: Conv2d(3,3,1) -> LeakyReLU -> Conv2d(3,3,1)
        "t1_w1": w(ks[4], 3, 3), "t1_b1": b(ks[5], 3),
        "t1_w2": w(ks[6], 3, 3), "t1_b2": b(ks[7], 3),
        # trans_mask_block_2 exists in __init__ but is never used in forward
        "t2_w1": w(ks[8], 3, 3), "t2_b1": b(ks[9], 3),
        "t2_w2": w(ks[10], 3, 3), "t2_b2": b(ks[11], 3),
    }


# ---------------------------------------------------------------------------
# Pure-JAX reference (follows the PyTorch op order exactly)
# ---------------------------------------------------------------------------
def _ref_conv_block(x, w1, b1, w2, b2):
    h = jnp.einsum("oi,nihw->nohw", w1, x) + b1.reshape(1, -1, 1, 1)
    h = jnp.where(h > 0, h, LEAKY_SLOPE * h)
    return jnp.einsum("oi,nihw->nohw", w2, h) + b2.reshape(1, -1, 1, 1)


def trans_high_ref(params, x, pyr_original, fake_low):
    pyr1, pyr2, pyr3 = pyr_original[1], pyr_original[2], pyr_original[3]
    mask = _ref_conv_block(x, params["m_w1"], params["m_b1"],
                           params["m_w2"], params["m_b2"])
    out = [fake_low, pyr1 * mask]
    for pyr in (pyr2, pyr3):
        hk, wk = pyr.shape[2], pyr.shape[3]
        mk = _nearest_resize_nchw(mask, hk, wk)
        mk = _ref_conv_block(mk, params["t1_w1"], params["t1_b1"],
                             params["t1_w2"], params["t1_b2"])
        out.append(pyr * mk)
    return out


if __name__ == "__main__":
    key = jax.random.PRNGKey(0)
    kp, kx, k0, k1, k2, k3, kf = jax.random.split(key, 7)

    params = init_params(kp)

    N, H, W = 2, 8, 8
    x = jax.random.normal(kx, (N, 9, H, W), jnp.float32)
    pyr_original = [
        jax.random.normal(k0, (N, 3, H, W), jnp.float32),           # [0] unused
        jax.random.normal(k1, (N, 3, H, W), jnp.float32),           # [1]
        jax.random.normal(k2, (N, 3, 2 * H, 2 * W), jnp.float32),   # [2]
        jax.random.normal(k3, (N, 3, 4 * H, 4 * W), jnp.float32),   # [3]
    ]
    fake_low = jax.random.normal(kf, (N, 3, H // 2, W // 2), jnp.float32)

    pyr_result = trans_high_forward(params, x, pyr_original, fake_low)
    pyr_result = jax.block_until_ready(pyr_result)

    # Correctness check against the pure-JAX reference.
    ref = trans_high_ref(params, x, pyr_original, fake_low)
    for got, want in zip(pyr_result, ref):
        assert got.shape == want.shape, (got.shape, want.shape)
        assert float(jnp.max(jnp.abs(got - want))) < 1e-4

    print("KERNEL_OK")
</pallas_src>

<mosaic_0001>
module attributes {stable_mosaic.version = 11 : i64} {
  func.func @_level1_kernel(%arg0: i32, %arg1: i32, %arg2: memref<1x9x64xf32, #tpu.memory_space<vmem>>, %arg3: memref<1x3x64xf32, #tpu.memory_space<vmem>>, %arg4: memref<9x9xf32, #tpu.memory_space<vmem>>, %arg5: memref<9x1xf32, #tpu.memory_space<vmem>>, %arg6: memref<3x9xf32, #tpu.memory_space<vmem>>, %arg7: memref<3x1xf32, #tpu.memory_space<vmem>>, %arg8: memref<3x3xf32, #tpu.memory_space<vmem>>, %arg9: memref<3x1xf32, #tpu.memory_space<vmem>>, %arg10: memref<3x3xf32, #tpu.memory_space<vmem>>, %arg11: memref<3x1xf32, #tpu.memory_space<vmem>>, %arg12: memref<1x3x64xf32, #tpu.memory_space<vmem>>, %arg13: memref<1x3x64xf32, #tpu.memory_space<vmem>>) attributes {dimension_semantics = [#tpu.dimension_semantics<parallel>, #tpu.dimension_semantics<parallel>], iteration_bounds = array<i64: 2, 1>, scalar_prefetch = 0 : i64, scratch_operands = 0 : i64, tpu.core_type = #tpu.core_type<tc>, window_params = [{transform_indices = @transform_0, window_bounds = array<i64: 1, 9, 64>}, {transform_indices = @transform_1, window_bounds = array<i64: 1, 3, 64>}, {pipeline_mode = #tpu.pipeline_mode<synchronous>, transform_indices = @transform_2, window_bounds = array<i64: 9, 9>}, {pipeline_mode = #tpu.pipeline_mode<synchronous>, transform_indices = @transform_3, window_bounds = array<i64: 9, 1>}, {pipeline_mode = #tpu.pipeline_mode<synchronous>, transform_indices = @transform_4, window_bounds = array<i64: 3, 9>}, {pipeline_mode = #tpu.pipeline_mode<synchronous>, transform_indices = @transform_5, window_bounds = array<i64: 3, 1>}, {pipeline_mode = #tpu.pipeline_mode<synchronous>, transform_indices = @transform_6, window_bounds = array<i64: 3, 3>}, {pipeline_mode = #tpu.pipeline_mode<synchronous>, transform_indices = @transform_7, window_bounds = array<i64: 3, 1>}, {pipeline_mode = #tpu.pipeline_mode<synchronous>, transform_indices = @transform_8, window_bounds = array<i64: 3, 3>}, {pipeline_mode = #tpu.pipeline_mode<synchronous>, transform_indices = @transform_9, window_bounds = array<i64: 3, 1>}, {transform_indices = @transform_10, window_bounds = array<i64: 1, 3, 64>}, {transform_indices = @transform_11, window_bounds = array<i64: 1, 3, 64>}]} {
    %c0 = arith.constant 0 : index
    %c0_0 = arith.constant 0 : index
    %c0_1 = arith.constant 0 : index
    %0 = vector.load %arg2[%c0, %c0_0, %c0_1] : memref<1x9x64xf32, #tpu.memory_space<vmem>>, vector<1x9x64xf32>
    %1 = vector.shape_cast %0 : vector<1x9x64xf32> to vector<9x64xf32>
    %c0_2 = arith.constant 0 : index
    %c0_3 = arith.constant 0 : index
    %2 = vector.load %arg4[%c0_2, %c0_3] : memref<9x9xf32, #tpu.memory_space<vmem>>, vector<9x9xf32>
    %cst = arith.constant dense<0.000000e+00> : vector<9x64xf32>
    %3 = tpu.matmul %2, %1, %cst {dimension_numbers = #tpu.dot_dimension_numbers<[1], [0], [0], [1], [0, 0, 1, 1], [], []>} : vector<9x9xf32>, vector<9x64xf32>, vector<9x64xf32> -> vector<9x64xf32>
    %c0_4 = arith.constant 0 : index
    %c0_5 = arith.constant 0 : index
    %4 = vector.load %arg5[%c0_4, %c0_5] : memref<9x1xf32, #tpu.memory_space<vmem>>, vector<9x1xf32>
    %5 = vector.broadcast %4 : vector<9x1xf32> to vector<9x64xf32>
    %6 = arith.addf %3, %5 : vector<9x64xf32>
    %cst_6 = arith.constant 0.000000e+00 : f32
    %7 = vector.broadcast %cst_6 : f32 to vector<9x64xf32>
    %8 = arith.cmpf ogt, %6, %7 : vector<9x64xf32>
    %cst_7 = arith.constant 0.00999999977 : f32
    %9 = vector.broadcast %cst_7 : f32 to vector<9x64xf32>
    %10 = arith.mulf %9, %6 : vector<9x64xf32>
    %11 = arith.select %8, %6, %10 : vector<9x64xi1>, vector<9x64xf32>
    %c0_8 = arith.constant 0 : index
    %c0_9 = arith.constant 0 : index
    %12 = vector.load %arg6[%c0_8, %c0_9] : memref<3x9xf32, #tpu.memory_space<vmem>>, vector<3x9xf32>
    %cst_10 = arith.constant dense<0.000000e+00> : vector<3x64xf32>
    %13 = tpu.matmul %12, %11, %cst_10 {dimension_numbers = #tpu.dot_dimension_numbers<[1], [0], [0], [1], [0, 0, 1, 1], [], []>} : vector<3x9xf32>, vector<9x64xf32>, vector<3x64xf32> -> vector<3x64xf32>
    %c0_11 = arith.constant 0 : index
    %c0_12 = arith.constant 0 : index
    %14 = vector.load %arg7[%c0_11, %c0_12] : memref<3x1xf32, #tpu.memory_space<vmem>>, vector<3x1xf32>
    %15 = vector.broadcast %14 : vector<3x1xf32> to vector<3x64xf32>
    %16 = arith.addf %13, %15 : vector<3x64xf32>
    %c0_13 = arith.constant 0 : index
    %c0_14 = arith.constant 0 : index
    %c0_15 = arith.constant 0 : index
    %17 = vector.load %arg3[%c0_13, %c0_14, %c0_15] : memref<1x3x64xf32, #tpu.memory_space<vmem>>, vector<1x3x64xf32>
    %18 = vector.shape_cast %17 : vector<1x3x64xf32> to vector<3x64xf32>
    %19 = arith.mulf %18, %16 : vector<3x64xf32>
    %c0_16 = arith.constant 0 : index
    %c0_17 = arith.constant 0 : index
    %c0_18 = arith.constant 0 : index
    %20 = vector.load %arg12[%c0_16, %c0_17, %c0_18] : memref<1x3x64xf32, #tpu.memory_space<vmem>>, vector<1x3x64xf32>
    %21 = vector.shape_cast %20 : vector<1x3x64xf32> to vector<3x64xf32>
    %22 = vector.shape_cast %19 : vector<3x64xf32> to vector<1x3x64xf32>
    tpu.vector_store %arg12[%c0_16, %c0_17, %c0_18], %22 {strides = array<i32>} : memref<1x3x64xf32, #tpu.memory_space<vmem>>, vector<1x3x64xf32>,
    %c0_19 = arith.constant 0 : index
    %c0_20 = arith.constant 0 : index
    %23 = vector.load %arg8[%c0_19, %c0_20] : memref<3x3xf32, #tpu.memory_space<vmem>>, vector<3x3xf32>
    %cst_21 = arith.constant dense<0.000000e+00> : vector<3x64xf32>
    %24 = tpu.matmul %23, %16, %cst_21 {dimension_numbers = #tpu.dot_dimension_numbers<[1], [0], [0], [1], [0, 0, 1, 1], [], []>} : vector<3x3xf32>, vector<3x64xf32>, vector<3x64xf32> -> vector<3x64xf32>
    %c0_22 = arith.constant 0 : index
    %c0_23 = arith.constant 0 : index
    %25 = vector.load %arg9[%c0_22, %c0_23] : memref<3x1xf32, #tpu.memory_space<vmem>>, vector<3x1xf32>
    %26 = vector.broadcast %25 : vector<3x1xf32> to vector<3x64xf32>
    %27 = arith.addf %24, %26 : vector<3x64xf32>
    %cst_24 = arith.constant 0.000000e+00 : f32
    %28 = vector.broadcast %cst_24 : f32 to vector<3x64xf32>
    %29 = arith.cmpf ogt, %27, %28 : vector<3x64xf32>
    %cst_25 = arith.constant 0.00999999977 : f32
    %30 = vector.broadcast %cst_25 : f32 to vector<3x64xf32>
    %31 = arith.mulf %30, %27 : vector<3x64xf32>
    %32 = arith.select %29, %27, %31 : vector<3x64xi1>, vector<3x64xf32>
    %c0_26 = arith.constant 0 : index
    %c0_27 = arith.constant 0 : index
    %33 = vector.load %arg10[%c0_26, %c0_27] : memref<3x3xf32, #tpu.memory_space<vmem>>, vector<3x3xf32>
    %cst_28 = arith.constant dense<0.000000e+00> : vector<3x64xf32>
    %34 = tpu.matmul %33, %32, %cst_28 {dimension_numbers = #tpu.dot_dimension_numbers<[1], [0], [0], [1], [0, 0, 1, 1], [], []>} : vector<3x3xf32>, vector<3x64xf32>, vector<3x64xf32> -> vector<3x64xf32>
    %c0_29 = arith.constant 0 : index
    %c0_30 = arith.constant 0 : index
    %35 = vector.load %arg11[%c0_29, %c0_30] : memref<3x1xf32, #tpu.memory_space<vmem>>, vector<3x1xf32>
    %36 = vector.broadcast %35 : vector<3x1xf32> to vector<3x64xf32>
    %37 = arith.addf %34, %36 : vector<3x64xf32>
    %c0_31 = arith.constant 0 : index
    %c0_32 = arith.constant 0 : index
    %c0_33 = arith.constant 0 : index
    %38 = vector.load %arg13[%c0_31, %c0_32, %c0_33] : memref<1x3x64xf32, #tpu.memory_space<vmem>>, vector<1x3x64xf32>
    %39 = vector.shape_cast %38 : vector<1x3x64xf32> to vector<3x64xf32>
    %40 = vector.shape_cast %37 : vector<3x64xf32> to vector<1x3x64xf32>
    tpu.vector_store %arg13[%c0_31, %c0_32, %c0_33], %40 {strides = array<i32>} : memref<1x3x64xf32, #tpu.memory_space<vmem>>, vector<1x3x64xf32>,
    return
  }
  func.func @transform_0(%arg0: i32, %arg1: i32) -> (i32, i32, i32) {
    %c0_i32 = arith.constant 0 : i32
    %c0_i32_0 = arith.constant 0 : i32
    return %arg0, %c0_i32, %arg1 : i32, i32, i32
  }
  func.func @transform_1(%arg0: i32, %arg1: i32) -> (i32, i32, i32) {
    %c0_i32 = arith.constant 0 : i32
    %c0_i32_0 = arith.constant 0 : i32
    return %arg0, %c0_i32, %arg1 : i32, i32, i32
  }
  func.func @transform_2(%arg0: i32, %arg1: i32) -> (i32, i32) {
    %c0_i32 = arith.constant 0 : i32
    %c0_i32_0 = arith.constant 0 : i32
    %c0_i32_1 = arith.constant 0 : i32
    return %c0_i32, %c0_i32_0 : i32, i32
  }
  func.func @transform_3(%arg0: i32, %arg1: i32) -> (i32, i32) {
    %c0_i32 = arith.constant 0 : i32
    %c0_i32_0 = arith.constant 0 : i32
    %c0_i32_1 = arith.constant 0 : i32
    return %c0_i32, %c0_i32_0 : i32, i32
  }
  func.func @transform_4(%arg0: i32, %arg1: i32) -> (i32, i32) {
    %c0_i32 = arith.constant 0 : i32
    %c0_i32_0 = arith.constant 0 : i32
    %c0_i32_1 = arith.constant 0 : i32
    return %c0_i32, %c0_i32_0 : i32, i32
  }
  func.func @transform_5(%arg0: i32, %arg1: i32) -> (i32, i32) {
    %c0_i32 = arith.constant 0 : i32
    %c0_i32_0 = arith.constant 0 : i32
    %c0_i32_1 = arith.constant 0 : i32
    return %c0_i32, %c0_i32_0 : i32, i32
  }
  func.func @transform_6(%arg0: i32, %arg1: i32) -> (i32, i32) {
    %c0_i32 = arith.constant 0 : i32
    %c0_i32_0 = arith.constant 0 : i32
    %c0_i32_1 = arith.constant 0 : i32
    return %c0_i32, %c0_i32_0 : i32, i32
  }
  func.func @transform_7(%arg0: i32, %arg1: i32) -> (i32, i32) {
    %c0_i32 = arith.constant 0 : i32
    %c0_i32_0 = arith.constant 0 : i32
    %c0_i32_1 = arith.constant 0 : i32
    return %c0_i32, %c0_i32_0 : i32, i32
  }
  func.func @transform_8(%arg0: i32, %arg1: i32) -> (i32, i32) {
    %c0_i32 = arith.constant 0 : i32
    %c0_i32_0 = arith.constant 0 : i32
    %c0_i32_1 = arith.constant 0 : i32
    return %c0_i32, %c0_i32_0 : i32, i32
  }
  func.func @transform_9(%arg0: i32, %arg1: i32) -> (i32, i32) {
    %c0_i32 = arith.constant 0 : i32
    %c0_i32_0 = arith.constant 0 : i32
    %c0_i32_1 = arith.constant 0 : i32
    return %c0_i32, %c0_i32_0 : i32, i32
  }
  func.func @transform_10(%arg0: i32, %arg1: i32) -> (i32, i32, i32) {
    %c0_i32 = arith.constant 0 : i32
    %c0_i32_0 = arith.constant 0 : i32
    return %arg0, %c0_i32, %arg1 : i32, i32, i32
  }
  func.func @transform_11(%arg0: i32, %arg1: i32) -> (i32, i32, i32) {
    %c0_i32 = arith.constant 0 : i32
    %c0_i32_0 = arith.constant 0 : i32
    return %arg0, %c0_i32, %arg1 : i32, i32, i32
  }
}

</mosaic_0001>

<bundles_post_ra>
// kernel: tpu_custom_call.1
= control target key start
LH: loop header
LB: loop body
LE: loop exit
PB: predicated region body
PF: predicated region fallthrough
CT: control target
= control target key end

     0   :  { %s1150_s17 = smov 0   ;;  %s1152_s18 = smov 0   ;;  %s1250_s0 = inlined_call_operand.vmem [shape: f32[2,9,64], index: 0, kind: input, shape index: {}]   ;;  %s1251_s1 = inlined_call_operand.vmem [shape: f32[2,3,64], index: 1, kind: input, shape index: {}]   ;;  %s1252_s2 = inlined_call_operand.vmem [shape: f32[9,9], index: 2, kind: input, shape index: {}]   ;;  %s1253_s3 = inlined_call_operand.vmem [shape: f32[9,1], index: 3, kind: input, shape index: {}]   ;;  %s1254_s4 = inlined_call_operand.vmem [shape: f32[3,9], index: 4, kind: input, shape index: {}]   ;;  %s1255_s5 = inlined_call_operand.vmem [shape: f32[3,1], index: 5, kind: input, shape index: {}]   ;;  %s1256_s6 = inlined_call_operand.vmem [shape: f32[3,3], index: 6, kind: input, shape index: {}]   ;;  %s1257_s7 = inlined_call_operand.vmem [shape: f32[3,1], index: 7, kind: input, shape index: {}]   ;;  %s1258_s8 = inlined_call_operand.vmem [shape: f32[3,3], index: 8, kind: input, shape index: {}]   ;;  %s1259_s9 = inlined_call_operand.vmem [shape: f32[3,1], index: 9, kind: input, shape index: {}]   ;;  %s1260_s10 = inlined_call_operand.vmem [shape: f32[2,3,64], index: 10, kind: output, shape index: {0}]   ;;  %s1261_s11 = inlined_call_operand.vmem [shape: f32[2,3,64], index: 11, kind: output, shape index: {1}]  }
   0x1   :  { %s1154_s19 = smov 0  }
   0x2 LB: > { %s34_s20 = sadd.s32 1, %s1079_s18  ;;  %p967_p0 = scmp.ge.s32.totalorder %s1083_s19, 1  ;;  %s1083_s19 = sphi %s1154_s19, %s22_s19   ;;  %s1079_s18 = sphi %s1152_s18, %s1265_s18   ;;  %s1075_s17 = sphi %s1150_s17, %s1264_s17  }
   0x3   : > { %p36_p1 = scmp.ge.s32.totalorder %s34_s20, 2  ;;  %p375_p2 = scmp.lt.s32.totalorder %s1083_s19, 3 }
   0x5   : > { %s1267_s20 = smov (%p36_p1, %s34_s20), 0  ;;  %p376_p3 = pnand %p967_p0, %p375_p2 }
   0x6   : > { %p434_p4 = scmp.lt.s32.totalorder (!%p376_p3), %s1075_s17, 1  ;;  %v465_v0 = vld [vmem:[%s1252_s2] sm:$0xff] (!%p376_p3)  ;;  %vm479_vm0 = vcmask (!%p376_p3), 72704   ;;  %v1085_v1 = vmov (!%p376_p3), 0   ;;  %vm486_vm1 = vcmask (!%p376_p3), 1040384   ;;  %vm1086_vm2 = vmmov (!%p376_p3), 1  }
   0x7   : > { %379 = sbr.rel (%p376_p3) target bundleno = 895 (0x37f), region = 60  ;;  %1000 = vmatprep.mubr.msk.f32.mxu0 (!%p376_p3), %vm479_vm0, %v465_v0  ;;  %1059 = vset.pattern.permute.xlu0 (!%p376_p3), %v1085_v1  ;;  %v467_v2 = vld [vmem:[%s1253_s3] sm:$0xff] (!%p376_p3)  ;;  %v468_v3 = vld [vmem:[%s1253_s3 + $0x8] sm:$0x1] (!%p376_p3)  ;;  %vm1184_vm3 = vmpackc.low (!%p376_p3), %vm486_vm1, %vm1086_vm2  ;;  %v1087_v10 = vmov (!%p376_p3), 0.0|0.0   ;;  %vm1088_vm4 = vmmov (!%p376_p3), 0  }
   0x8   : > { %471 = vperm.xlu0 (!%p376_p3), %1059, %v467_v2   ;;  %1060 = vset.pattern.permute.xlu1 (!%p376_p3), %v1085_v1  ;;  %v747_v8 = vld [vmem:[%s1259_s9] sm:$0x7] (!%p376_p3)  ;;  %v466_v9 = vld [vmem:[%s1252_s2 + $0x8] sm:$0x1] (!%p376_p3)  ;;  %v1089_v11 = vmov (!%p376_p3), 0.0   ;;  %vm669_vm7 = vcmask (!%p376_p3), 1042432  }
   0x9   : > { %1026 = vmatprep.subr.bf16.mxu1 (!%p376_p3), %v1087_v10  ;;  %1007 = vmatprep.mubr.msk.f32.mxu1 (!%p376_p3), %vm1088_vm4, %v1089_v11  ;;  %v572_v12 = vld [vmem:[%s1255_s5] sm:$0x7] (!%p376_p3)  ;;  %vm665_vm8 = vcmask (!%p376_p3), 23552   ;;  %vm656_vm9 = vcmask (!%p376_p3), 518144  }
   0xa   : > { %575 = vperm.xlu1 (!%p376_p3), %1060, %v572_v12   ;;  %v659_v13 = vld [vmem:[%s1257_s7] sm:$0x7] (!%p376_p3) }
   0xb   : > { %v571_v25 = vld [vmem:[%s1254_s4] sm:$0x7] (!%p376_p3) }
   0xc   : > { %476 = vperm.xlu0 (!%p376_p3), %1059, %v468_v3   ;;  %v658_v31 = vld [vmem:[%s1256_s6] sm:$0x7] (!%p376_p3) }
   0xd   : > { %v746_v38 = vld [vmem:[%s1258_s8] sm:$0x7] (!%p376_p3) }
   0xe   : > { %s1269_s17 = smov (!%p434_p4, %s1075_s17), 1  ;;  %662 = vperm.xlu1 %1060, %v659_v13  }
   0xf   : > { %s984_s27 = sshll.u32 %s1269_s17, 4  ;;  %s1215_s26 = sshll.u32 %s1269_s17, 2 }
  0x10   : > { %s441_s30 = scalar_lea.vmem %s1250_s0, %s984_s27  ;;  %750 = vperm.xlu0 %1059, %v747_v8   ;;  %s448_s29 = scalar_lea.vmem %s1251_s1, %s1215_s26 }
  0x11   : > { %v463_v4 = vld [vmem:[%s441_s30] sm:$0xff]  ;;  %v464_v5 = vld [vmem:[%s441_s30 + $0x8] sm:$0x1]  ;;  %s455_s14 = scalar_lea.vmem %s1260_s10, %s1215_s26  ;;  %s462_s23 = scalar_lea.vmem %s1261_s11, %s1215_s26 }
  0x12   : > { %v1020_v7 = vpack.c.bf16 %v464_v5, %v463_v4  ;;  %v654_v28 = vld [vmem:[%s448_s29] sm:$0x7] }
  0x14   : > { %1022 = vmatprep.subr.msk.bf16.mxu0 %vm1184_vm3, %v1020_v7 }
  0x15   : > { %1025 = vmatpush3.bf16.msk.msra.mxu0 %vm1184_vm3, %v1020_v7 }
  0x16   : > { %1010 = vmatprep.subr.mxu0 %v1089_v11 }
  0x18   : > { %1001 = vmatmul.mubr.msk.f32.vlgmr.msra.gmra.mrb[0].mxu0 %vm479_vm0, %v466_v9 }
  0x19   : > { %1012 = vmatprep.mubr.msk.f32.mxu0 %vm1088_vm4, %v1089_v11 }
  0x87   : > { %v472_v14 = vpop.permute.xlu0 %471 }
  0x89   : > { %v576_v26 = vpop.permute.xlu1 %575 }
  0x8b   : > { %v477_v15 = vpop.permute.xlu0 %476 }
  0x8d   : > { %v663_v33 = vpop.permute.xlu1 %662 }
  0x8f   : > { %v751_v40 = vpop.permute.xlu0 %750 }
  0xeb   : > { %v1002_v16 = vpop.f32.mrb[0].mxu0 }
  0xec   : > { %v562_v17 = vadd.f32 %v1002_v16, %v477_v15  ;;  %v556_v18 = vpop.f32.mrb[1].mxu0 }
  0xed   : > { %v557_v19 = vadd.f32 %v556_v18, %v472_v14 }
  0xee   : > { %vm566_vm5 = vcmp.gt.f32.partialorder %v562_v17, 0.0  ;;  %v568_v20 = vmul.f32 0.01, %v562_v17 }
  0xef   : > { %vm565_vm6 = vcmp.gt.f32.partialorder %v557_v19, 0.0  ;;  %v567_v21 = vmul.f32 0.01, %v557_v19 }
  0xf0   : > { %v570_v22 = vsel %vm566_vm5, %v562_v17, %v568_v20 }
  0xf1   : > { %v569_v23 = vsel %vm565_vm6, %v557_v19, %v567_v21 }
  0xf2   : > { %v1027_v24 = vpack.c.bf16 %v570_v22, %v569_v23 }
  0xf4   : > { %1029 = vmatpush3.bf16.msk.msra.mxu1 %vm1184_vm3, %v1027_v24 }
  0xf5   : > { %1015 = vmatprep.subr.mxu1 %v1089_v11 }
  0xf7   : > { %1008 = vmatmul.mubr.msk.f32.vlgmr.msra.gmra.mrb[0].mxu1 %vm479_vm0, %v571_v25 }
  0xf8   : > { %1017 = vmatprep.mubr.msk.f32.mxu1 %vm1088_vm4, %v1089_v11 }
 0x1ca   : > { %v650_v27 = vpop.f32.mrb[0].mxu1 }
 0x1cb   : > { %v651_v29 = vadd.f32 %v650_v27, %v576_v26  ;;  %v1009_v30 = vpop.f32.mrb[1].mxu1 }
 0x1cd   : > { %v655_v32 = vmul.f32 %v654_v28, %v651_v29  ;;  %1011 = vmatpush3.msk.msra.mxu0 %vm669_vm7, %v651_v29 }
 0x1ce   : > { %1013 = vmatmul.mubr.msk.f32.vlgmr.msra.gmra.mrb[2].mxu0 %vm665_vm8, %v658_v31 }
 0x1cf   : > { %657 = vst.msk [vmem:[%s455_s14] sm:$0x7] %vm656_vm9, %v655_v32 }
 0x2a1   : > { %v739_v34 = vpop.f32.mrb[2].mxu0 }
 0x2a2   : > { %v740_v35 = vadd.f32 %v739_v34, %v663_v33  ;;  %v1014_v36 = vpop.f32.mrb[3].mxu0 }
 0x2a4   : > { %vm743_vm10 = vcmp.gt.f32.partialorder %v740_v35, 0.0  ;;  %v744_v37 = vmul.f32 0.01, %v740_v35 }
 0x2a6   : > { %v745_v39 = vsel %vm743_vm10, %v740_v35, %v744_v37 }
 0x2a7   : > { %1016 = vmatpush3.msk.msra.mxu1 %vm669_vm7, %v745_v39 }
 0x2a8   : > { %1018 = vmatmul.mubr.msk.f32.vlgmr.msra.gmra.mrb[2].mxu1 %vm665_vm8, %v746_v38 }
 0x37b   : > { %v825_v41 = vpop.f32.mrb[2].mxu1 }
 0x37c   : > { %v826_v42 = vadd.f32 %v825_v41, %v751_v40  ;;  %v1019_v43 = vpop.f32.mrb[3].mxu1 }
 0x37e   : > { %829 = vst.msk [vmem:[%s462_s23] sm:$0x7] %vm656_vm9, %v826_v42 }
 0x37f PF: > { %s22_s19 = sadd.s32 1, %s1083_s19   ;;  %s1264_s17 = smov %s1079_s18 }
 0x380   : > { %p19_p5 = scmp.ge.s32.totalorder %s22_s19, 4   ;;  %s1265_s18 = smov %s1267_s20 }
 0x382   :  { %21 = sbr.rel (!%p19_p5) target bundleno = 2 (0x2), region = 105 }

</bundles_post_ra>
